<compile_context>
chip_gen: v5e
topology: v5e:2x2
jax: 0.10.0
libtpu: 0.0.40
codegen_flags: <defaults>
</compile_context>

<pallas_src>
import functools
import math

import jax
import jax.numpy as jnp
from jax.experimental import pallas as pl
from jax.experimental.pallas import tpu as pltpu


def _pe_kernel(freq_ref, off_ref, par_ref, out_ref, *, positions_per_row):
    """Fill one (tile_rows, width) tile of the flattened PE table.

    For flat index f = row * width + lane (pos = f // dmodel, col = f % dmodel)
        table[pos, col] = sin(pos * inv_freq[col])   if col even
                          cos(pos * inv_freq[col])   if col odd
    pos is reconstructed exactly as row * positions_per_row + (lane // dmodel);
    inv_freq, the per-lane position offset and the parity mask arrive as
    precomputed (1, width) vectors.
    """
    tile_rows = out_ref.shape[0]
    base = pl.program_id(0) * (tile_rows * positions_per_row)
    row_ids = jax.lax.broadcasted_iota(jnp.int32, (tile_rows, 1), 0)
    # Positions are integers < 2^24, hence exact in f32; the (tile_rows, 1)
    # int->f32 convert is a tiny column, negligible next to the full-width work.
    row_pos = (row_ids * positions_per_row + base).astype(jnp.float32)
    pos = row_pos + off_ref[...]            # (tile_rows, width) exact positions
    angle = pos * freq_ref[...]             # single f32 rounding, == reference
    s = jnp.sin(angle)
    c = jnp.cos(angle)
    out_ref[...] = jnp.where(par_ref[...] > 0.5, c, s)


def _column_vectors(dmodel, width):
    """Per-lane inv_freq / position-offset / parity vectors, shape (1, width).

    Requires width % dmodel == 0 (enforced by the caller).
    """
    lane = jnp.arange(width, dtype=jnp.int32)
    col = lane % dmodel
    inv_freq = jnp.power(
        10000.0, -(2.0 * (col // 2).astype(jnp.float32)) / float(dmodel)
    ).astype(jnp.float32)
    off = (lane // dmodel).astype(jnp.float32)      # position-in-row per lane
    par = (col % 2).astype(jnp.float32)             # 1.0 on odd (cos) lanes
    return inv_freq[None, :], off[None, :], par[None, :]


def _choose_width(max_seq_length, dmodel):
    """Lane-dense slab width (multiple of 128) when cheaply reachable."""
    total = max_seq_length * dmodel
    if dmodel % 128 == 0:
        return dmodel                      # already lane-dense
    width = math.lcm(dmodel, 128)
    if width <= 2048 and total % width == 0:
        return width                       # repack into lane-dense rows
    return dmodel                          # correct fallback (may mask stores)


def _choose_tile_rows(rows, width, itemsize=4, block_budget_bytes=2 << 20):
    """Largest tile (multiple of 8, dividing `rows`) with a <= ~2 MiB output
    block; for multi-step grids prefer an even step count (v7x's 2 TCs)."""
    if rows % 8 != 0:
        return rows                        # single full-extent block
    max_rows = max(8, (block_budget_bytes // (width * itemsize)) // 8 * 8)
    if rows <= max_rows:
        return rows                        # whole table <= ~2 MiB: one step
    tile = 8
    for t in range(max_rows, 7, -8):
        if rows % t == 0:
            tile = t
            break
    if (rows // tile) % 2 == 1:            # try for an even grid, within 2x
        lower = max(8, ((tile // 2) // 8) * 8)
        for t in range(tile - 8, lower - 1, -8):
            if rows % t == 0 and (rows // t) % 2 == 0:
                tile = t
                break
    return tile


def _build_table(max_seq_length, dmodel):
    """Materialize the (1, max_seq_length, dmodel) float32 PE table on-TPU."""
    assert dmodel % 2 == 0, "PositionalEncoding requires an even dmodel"
    width = _choose_width(max_seq_length, dmodel)
    total = max_seq_length * dmodel
    rows = total // width
    positions_per_row = width // dmodel
    tile_rows = _choose_tile_rows(rows, width)
    grid = (rows // tile_rows,)

    freq, off, par = _column_vectors(dmodel, width)

    flat = pl.pallas_call(
        functools.partial(_pe_kernel, positions_per_row=positions_per_row),
        out_shape=jax.ShapeDtypeStruct((rows, width), jnp.float32),
        grid_spec=pltpu.PrefetchScalarGridSpec(
            num_scalar_prefetch=0,
            grid=grid,
            in_specs=[
                pl.BlockSpec((1, width), lambda i: (0, 0)),
                pl.BlockSpec((1, width), lambda i: (0, 0)),
                pl.BlockSpec((1, width), lambda i: (0, 0)),
            ],
            out_specs=pl.BlockSpec((tile_rows, width), lambda i: (i, 0)),
        ),
        compiler_params=pltpu.CompilerParams(
            dimension_semantics=("parallel",),
        ),
    )(freq, off, par)

    # Row-major flatten of (rows, width) equals that of (max_seq, dmodel)
    # because width % dmodel == 0, so this reshape is free layout plumbing.
    return flat.reshape(1, max_seq_length, dmodel)


# The table is a compile-time constant of the module; cache per config so
# repeated forward() calls never relaunch the kernel.
# NOTE: keyed only on (max_seq_length, dmodel); in multi-device/sharded
# contexts the cached array lives on whatever device built it first.
_TABLE_CACHE = {}


def positional_encoding_forward(embeddings_batch, max_seq_length, dmodel):
    """Mirrors PositionalEncoding.forward: the input is ignored and the
    (1, max_seq_length, dmodel) float32 PE table is returned."""
    del embeddings_batch  # forward() returns the table regardless of input
    key = (int(max_seq_length), int(dmodel))
    tbl = _TABLE_CACHE.get(key)
    if tbl is None:
        tbl = _build_table(max_seq_length, dmodel)
        _TABLE_CACHE[key] = tbl
    return tbl


def _reference_table(max_seq_length, dmodel):
    """Pure-JAX reference matching the PyTorch __init__ construction."""
    position_ids = jnp.arange(0, max_seq_length, dtype=jnp.float32)[:, None]
    frequencies = jnp.power(
        10000.0, -jnp.arange(0, dmodel, 2, dtype=jnp.float32) / dmodel)
    table = jnp.zeros((max_seq_length, dmodel), dtype=jnp.float32)
    table = table.at[:, 0::2].set(jnp.sin(position_ids * frequencies))
    table = table.at[:, 1::2].set(jnp.cos(position_ids * frequencies))
    return table[None, :, :]


if __name__ == "__main__":
    # Small shapes consistent with the module: batch=2, seq=8, dmodel=32,
    # module configured with max_seq_length=128.
    dmodel = 32
    max_seq_length = 128
    batch, seq = 2, 8

    key = jax.random.PRNGKey(0)
    embeddings_batch = jax.random.normal(key, (batch, seq, dmodel),
                                         dtype=jnp.float32)

    out = positional_encoding_forward(embeddings_batch, max_seq_length, dmodel)
    out = jax.block_until_ready(out)

    ref = _reference_table(max_seq_length, dmodel)
    assert out.shape == (1, max_seq_length, dmodel)
    assert out.dtype == jnp.float32
    # Same angle, true sin/cos per parity -> only sin/cos implementation-level
    # ulp differences remain.
    assert jnp.allclose(out, ref, atol=2e-5, rtol=1e-5), float(
        jnp.max(jnp.abs(out - ref)))

    # Second call hits the cache (no kernel relaunch) and stays correct.
    out2 = positional_encoding_forward(embeddings_batch, max_seq_length, dmodel)
    assert jnp.allclose(out2, ref, atol=2e-5, rtol=1e-5)

    print("KERNEL_OK")
</pallas_src>

<mosaic_0001>
module attributes {stable_mosaic.version = 11 : i64} {
  func.func @_pe_kernel(%arg0: i32, %arg1: memref<1x128xf32, #tpu.memory_space<vmem>>, %arg2: memref<1x128xf32, #tpu.memory_space<vmem>>, %arg3: memref<1x128xf32, #tpu.memory_space<vmem>>, %arg4: memref<32x128xf32, #tpu.memory_space<vmem>>) attributes {dimension_semantics = [#tpu.dimension_semantics<parallel>], iteration_bounds = array<i64: 1>, scalar_prefetch = 0 : i64, scratch_operands = 0 : i64, tpu.core_type = #tpu.core_type<tc>, window_params = [{pipeline_mode = #tpu.pipeline_mode<synchronous>, transform_indices = @transform_0, window_bounds = array<i64: 1, 128>}, {pipeline_mode = #tpu.pipeline_mode<synchronous>, transform_indices = @transform_1, window_bounds = array<i64: 1, 128>}, {pipeline_mode = #tpu.pipeline_mode<synchronous>, transform_indices = @transform_2, window_bounds = array<i64: 1, 128>}, {transform_indices = @transform_3, window_bounds = array<i64: 32, 128>}]} {
    %c128_i32 = arith.constant 128 : i32
    %0 = arith.muli %arg0, %c128_i32 : i32
    %1 = tpu.iota {dimensions = array<i32: 0>} : vector<32x1xi32>
    %c4_i32 = arith.constant 4 : i32
    %2 = vector.broadcast %c4_i32 : i32 to vector<32x1xi32>
    %3 = arith.muli %1, %2 : vector<32x1xi32>
    %4 = vector.broadcast %0 : i32 to vector<32x1xi32>
    %5 = arith.addi %3, %4 : vector<32x1xi32>
    %6 = arith.sitofp %5 : vector<32x1xi32> to vector<32x1xf32>
    %c0 = arith.constant 0 : index
    %c0_0 = arith.constant 0 : index
    %7 = vector.load %arg2[%c0, %c0_0] : memref<1x128xf32, #tpu.memory_space<vmem>>, vector<1x128xf32>
    %8 = vector.broadcast %6 : vector<32x1xf32> to vector<32x128xf32>
    %9 = vector.broadcast %7 : vector<1x128xf32> to vector<32x128xf32>
    %10 = arith.addf %8, %9 : vector<32x128xf32>
    %c0_1 = arith.constant 0 : index
    %c0_2 = arith.constant 0 : index
    %11 = vector.load %arg1[%c0_1, %c0_2] : memref<1x128xf32, #tpu.memory_space<vmem>>, vector<1x128xf32>
    %12 = vector.broadcast %11 : vector<1x128xf32> to vector<32x128xf32>
    %13 = arith.mulf %10, %12 : vector<32x128xf32>
    %14 = math.sin %13 : vector<32x128xf32>
    %15 = math.cos %13 : vector<32x128xf32>
    %c0_3 = arith.constant 0 : index
    %c0_4 = arith.constant 0 : index
    %16 = vector.load %arg3[%c0_3, %c0_4] : memref<1x128xf32, #tpu.memory_space<vmem>>, vector<1x128xf32>
    %cst = arith.constant 5.000000e-01 : f32
    %17 = vector.broadcast %cst : f32 to vector<1x128xf32>
    %18 = arith.cmpf ogt, %16, %17 : vector<1x128xf32>
    %19 = vector.shape_cast %18 : vector<1x128xi1> to vector<1x128xi1>
    %20 = vector.broadcast %19 : vector<1x128xi1> to vector<32x128xi1>
    %21 = arith.select %20, %15, %14 : vector<32x128xi1>, vector<32x128xf32>
    %c0_5 = arith.constant 0 : index
    %c0_6 = arith.constant 0 : index
    %22 = vector.load %arg4[%c0_5, %c0_6] : memref<32x128xf32, #tpu.memory_space<vmem>>, vector<32x128xf32>
    tpu.vector_store %arg4[%c0_5, %c0_6], %21 {strides = array<i32>} : memref<32x128xf32, #tpu.memory_space<vmem>>, vector<32x128xf32>,
    return
  }
  func.func @transform_0(%arg0: i32) -> (i32, i32) {
    %c0_i32 = arith.constant 0 : i32
    %c0_i32_0 = arith.constant 0 : i32
    %c0_i32_1 = arith.constant 0 : i32
    return %c0_i32, %c0_i32_0 : i32, i32
  }
  func.func @transform_1(%arg0: i32) -> (i32, i32) {
    %c0_i32 = arith.constant 0 : i32
    %c0_i32_0 = arith.constant 0 : i32
    %c0_i32_1 = arith.constant 0 : i32
    return %c0_i32, %c0_i32_0 : i32, i32
  }
  func.func @transform_2(%arg0: i32) -> (i32, i32) {
    %c0_i32 = arith.constant 0 : i32
    %c0_i32_0 = arith.constant 0 : i32
    %c0_i32_1 = arith.constant 0 : i32
    return %c0_i32, %c0_i32_0 : i32, i32
  }
  func.func @transform_3(%arg0: i32) -> (i32, i32) {
    %c0_i32 = arith.constant 0 : i32
    %c0_i32_0 = arith.constant 0 : i32
    return %arg0, %c0_i32 : i32, i32
  }
}

</mosaic_0001>

<bundles_post_ra>
// kernel: tpu_custom_call.1
= control target key start
LH: loop header
LB: loop body
LE: loop exit
PB: predicated region body
PF: predicated region fallthrough
CT: control target
= control target key end

     0   :  { %8 = vsyncpa [#allocation3], 0  ;;  %s2028_s0 = inlined_call_operand.hbm [shape: f32[1,128], index: 0, kind: input, shape index: {}]   ;;  %s2029_s1 = inlined_call_operand.hbm [shape: f32[1,128], index: 1, kind: input, shape index: {}]   ;;  %s2030_s2 = inlined_call_operand.vmem [shape: f32[1,128], index: 2, kind: input, shape index: {}]   ;;  %s2031_s3 = inlined_call_operand.hbm [shape: f32[32,128], index: 3, kind: output, shape index: {}]  }
   0x1   :  { %9 = vsyncpa [#allocation6], 0 }
   0x2   :  { %10 = vsyncpa [#allocation4], 0  ;;  %s16_s14 = sshll.u32 %s2028_s0, 4  ;;  %s1463_s15 = smov [#allocation2]   ;;  %s17_s14 = int_to_ptr.hbm [resolvable:$true] %s16_s14 }
   0x3   :  { %s18_s16 = sshll.u32 %s1463_s15, 4  ;;  %s27_s19 = sshll.u32 %s2029_s1, 4  ;;  %s19_s16 = int_to_ptr.vmem [resolvable:$true] %s18_s16  ;;  %s28_s19 = int_to_ptr.hbm [resolvable:$true] %s27_s19 }
   0x4   :  { %21 = dma.hbm_to_vmem [thread:$0]  %s17_s14, 16, %s19_s16, [#allocation3]  }
   0x5   :  { %s1464_s20 = smov [#allocation5]  }
   0x6   :  { %s29_s21 = sshll.u32 %s1464_s20, 4  ;;  %s30_s21 = int_to_ptr.vmem [resolvable:$true] %s29_s21 }
   0x7   :  { %32 = dma.hbm_to_vmem [thread:$0]  %s28_s19, 16, %s30_s21, [#allocation6]  }
   0x8   :  { %1457 = dma.done.wait [#allocation3], 16  }
   0x9   :  { %1458 = vsyncadd [#allocation3], 4294967280 }
   0xa   :  { %1459 = dma.done.wait [#allocation6], 16  }
   0xb   :  { %1460 = vsyncadd [#allocation6], 4294967280  ;;  %v44_v0 = vlaneseq  ;;  %v1506_v8 = vld [vmem:[#allocation5] ss:$0 sm:$0xff]  ;;  %v1508_v11 = vld [vmem:[#allocation2] ss:$0 sm:$0xff] }
   0xc   :  { %v1465_v43 = vmov 683565275   ;;  %v1466_v45 = vmov 2475754826   ;;  %v1467_v47 = vmov 2131351028  }
   0xd   :  { %v1501_v1 = vshrl.u32 %v44_v0, 7  ;;  %v1468_v49 = vmov 2102212464   ;;  %v1469_v51 = vmov 920167782   ;;  %s1333_s25 = sshll.u32 %s2031_s3, 4  ;;  %s1334_s25 = int_to_ptr.hbm [resolvable:$true] %s1333_s25 }
   0xe   :  { %v1470_v60 = vmov 1326507024   ;;  %s1473_s26 = smov 128   ;;  %s1474_s27 = smov 8  }
   0xf   :  { %v46_v2 = vadd.s32 8, %v1501_v1  ;;  %v47_v3 = vadd.s32 16, %v1501_v1  ;;  %v49_v4 = vmul.u32 4, %v1501_v1 }
  0x11   :  { %v50_v5 = vmul.u32 4, %v46_v2  ;;  %v51_v6 = vmul.u32 4, %v47_v3  ;;  %v58_v7 = vcvt.s32.f32 %v49_v4 }
  0x13   :  { %v59_v9 = vcvt.s32.f32 %v50_v5  ;;  %v60_v10 = vcvt.s32.f32 %v51_v6  ;;  %v66_v12 = vadd.f32 %v1506_v8, %v58_v7 }
  0x15   :  { %v67_v13 = vadd.f32 %v1506_v8, %v59_v9  ;;  %v68_v14 = vadd.f32 %v1506_v8, %v60_v10  ;;  %v1514_v15 = vmul.f32 %v1508_v11, %v66_v12 }
  0x17   :  { %v1517_v16 = vmul.f32 %v1508_v11, %v67_v13  ;;  %v1520_v17 = vmul.f32 %v1508_v11, %v68_v14  ;;  %v78_v18 = vand.u32 2147483647, %v1514_v15  ;;  %v81_v19 = vand.u32 2139095040, %v1514_v15 }
  0x19   :  { %v233_v20 = vand.u32 2147483647, %v1517_v16  ;;  %v236_v21 = vand.u32 2139095040, %v1517_v16  ;;  %v391_v22 = vand.u32 2139095040, %v1520_v17  ;;  %v82_v23 = vshrl.u32 %v81_v19, 23 }
  0x1a   :  { %v85_v24 = vand.u32 8388607, %v78_v18 }
  0x1b   :  { %v237_v25 = vshrl.u32 %v236_v21, 23  ;;  %v240_v26 = vand.u32 8388607, %v233_v20  ;;  %v1347_v27 = vadd.s32 4294967169, %v82_v23  ;;  %v392_v30 = vshrl.u32 %v391_v22, 23 }
  0x1c   :  { %v86_v28 = vor.u32 8388608, %v85_v24 }
  0x1d   :  { %v1350_v29 = vadd.s32 4294967169, %v237_v25  ;;  %v88_v31 = vadd.s32 1, %v1347_v27  ;;  %v241_v32 = vor.u32 8388608, %v240_v26  ;;  %v1353_v36 = vadd.s32 4294967169, %v392_v30 }
  0x1e   :  { %v1531_v35 = vshll.u32 %v86_v28, 8 }
  0x1f   :  { %v243_v33 = vadd.s32 1, %v1350_v29  ;;  %vm89_vm0 = vcmp.gt.s32.totalorder %v88_v31, 0  ;;  %v1537_v41 = vshll.u32 %v241_v32, 8  ;;  %v1545_v54 = vadd.s32 1, %v1353_v36 }
  0x20   :  { %v90_v34 = vsel %vm89_vm0, %v88_v31, 0  ;;  %v127_v53 = vand.u32 65535, %v1531_v35  ;;  %v128_v58 = vshrl.u32 %v1531_v35, 16 }
  0x21   :  { %vm244_vm1 = vcmp.gt.s32.totalorder %v243_v33, 0  ;;  %v92_v37 = vand.u32 31, %v90_v34  ;;  %v1533_v39 = vshrl.u32 %v90_v34, 5  ;;  %vm399_vm15 = vcmp.gt.s32.totalorder %v1545_v54, 0 }
  0x22   :  { %v245_v38 = vsel %vm244_vm1, %v243_v33, 0 }
  0x23   :  { %v1535_v40 = vand.u32 31, %v245_v38  ;;  %v93_v42 = vsub.s32 32, %v92_v37  ;;  %v95_v44 = vshll.u32 %v1465_v43, %v92_v37  ;;  %v98_v46 = vshll.u32 %v1466_v45, %v92_v37 }
  0x24   :  { %v101_v48 = vshll.u32 %v1467_v47, %v92_v37  ;;  %v104_v50 = vshll.u32 %v1468_v49, %v92_v37  ;;  %v107_v52 = vshll.u32 %v1469_v51, %v92_v37  ;;  %vm110_vm2 = vcmp.lt.s32.totalorder %v1533_v39, 1 }
  0x25   :  { %v96_v55 = vshrl.u32 %v1466_v45, %v93_v42  ;;  %v99_v56 = vshrl.u32 %v1467_v47, %v93_v42  ;;  %v102_v57 = vshrl.u32 %v1468_v49, %v93_v42  ;;  %v105_v59 = vshrl.u32 %v1469_v51, %v93_v42 }
  0x26   :  { %v108_v61 = vshrl.u32 %v1470_v60, %v93_v42  ;;  %vm113_vm3 = vcmp.lt.s32.totalorder %v1533_v39, 4  ;;  %v1556_v2 = vsub.s32 32, %v1535_v40  ;;  %v94_v3 = vshrl.u32 %v1465_v43, %v93_v42 }
  0x27   :  { %v97_v62 = vor.u32 %v96_v55, %v95_v44  ;;  %v100_v63 = vor.u32 %v99_v56, %v98_v46  ;;  %v103_v0 = vor.u32 %v102_v57, %v101_v48  ;;  %v106_v4 = vor.u32 %v105_v59, %v104_v50 }
  0x28   :  { %v109_v5 = vor.u32 %v108_v61, %v107_v52  ;;  %vm112_vm4 = vcmp.lt.s32.totalorder %v1533_v39, 3  ;;  %vm111_vm5 = vcmp.lt.s32.totalorder %v1533_v39, 2  ;;  %v1565_v9 = vshrl.u32 %v245_v38, 5 }
  0x29   :  { %v118_v6 = vsel %vm110_vm2, %v97_v62, %v100_v63  ;;  %v122_v7 = vsel %vm110_vm2, %v100_v63, %v103_v0  ;;  %v119_v10 = vsel %vm113_vm3, %v106_v4, 920167782  ;;  %v250_v13 = vshll.u32 %v1465_v43, %v1535_v40 }
  0x2a   :  { %v123_v12 = vsel %vm113_vm3, %v109_v5, 1326507024  ;;  %v253_v14 = vshll.u32 %v1466_v45, %v1535_v40  ;;  %v115_v19 = vsel %vm113_vm3, %v103_v0, 2102212464  ;;  %v120_v21 = vsel %vm112_vm4, %v103_v0, %v119_v10 }
  0x2b   :  { %v124_v22 = vsel %vm112_vm4, %v106_v4, %v123_v12  ;;  %v251_v23 = vshrl.u32 %v1466_v45, %v1556_v2  ;;  %v114_v24 = vsel %vm110_vm2, %v94_v3, %v97_v62  ;;  %v121_v25 = vsel %vm111_vm5, %v118_v6, %v120_v21 }
  0x2c   :  { %v125_v26 = vsel %vm111_vm5, %v122_v7, %v124_v22  ;;  %v254_v27 = vshrl.u32 %v1467_v47, %v1556_v2  ;;  %v151_v30 = vand.u32 65535, %v121_v25  ;;  %v152_v31 = vshrl.u32 %v121_v25, 16 }
  0x2d   :  { %v129_v28 = vand.u32 65535, %v125_v26  ;;  %v130_v29 = vshrl.u32 %v125_v26, 16  ;;  %v116_v32 = vsel %vm112_vm4, %v100_v63, %v115_v19  ;;  %v1593_v33 = vor.u32 %v251_v23, %v250_v13 }
  0x2e   :  { %v1595_v34 = vor.u32 %v254_v27, %v253_v14  ;;  %v256_v36 = vshll.u32 %v1467_v47, %v1535_v40  ;;  %v257_v44 = vshrl.u32 %v1468_v49, %v1556_v2  ;;  %v153_v48 = vmul.u32 %v151_v30, %v127_v53 }
  0x2f   :  { %v131_v37 = vmul.u32 %v129_v28, %v127_v53  ;;  %v132_v38 = vmul.u32 %v130_v29, %v127_v53  ;;  %v133_v42 = vmul.u32 %v129_v28, %v128_v58  ;;  %v134_v46 = vmul.u32 %v130_v29, %v128_v58 }
  0x30   :  { %v154_v50 = vmul.u32 %v152_v31, %v127_v53  ;;  %v155_v52 = vmul.u32 %v151_v30, %v128_v58  ;;  %v156_v59 = vmul.u32 %v152_v31, %v128_v58  ;;  %v259_v5 = vshll.u32 %v1468_v49, %v1535_v40 }
  0x31   :  { %v135_v55 = vshll.u32 %v132_v38, 16  ;;  %v136_v56 = vshrl.u32 %v132_v38, 16  ;;  %v137_v57 = vshll.u32 %v133_v42, 16  ;;  %v138_v61 = vshrl.u32 %v133_v42, 16 }
  0x32   :  { %v157_v62 = vshll.u32 %v154_v50, 16  ;;  %v158_v63 = vshrl.u32 %v154_v50, 16  ;;  %v159_v0 = vshll.u32 %v155_v52, 16  ;;  %v160_v4 = vshrl.u32 %v155_v52, 16 }
  0x33   :  { %vm139_vm6 = vc.u32 %v131_v37, %v135_v55  ;;  %v141_v3 = vadd.s32 %v135_v55, %v131_v37  ;;  %v1471_v6 = vmov 0   ;;  %v260_v10 = vshrl.u32 %v1469_v51, %v1556_v2 }
  0x34   :  { %v140_v7 = vsel %vm139_vm6, 1, %v1471_v6  ;;  %vm161_vm7 = vc.u32 %v153_v48, %v157_v62  ;;  %v163_v53 = vadd.s32 %v157_v62, %v153_v48  ;;  %v262_v13 = vshll.u32 %v1469_v51, %v1535_v40 }
  0x35   :  { %v142_v12 = vadd.s32 %v140_v7, %v134_v46  ;;  %vm143_vm8 = vc.u32 %v141_v3, %v137_v57  ;;  %v162_v58 = vsel %vm161_vm7, 1, %v1471_v6  ;;  %v258_v21 = vor.u32 %v257_v44, %v256_v36 }
  0x36   :  { %v144_v14 = vsel %vm143_vm8, 1, %v1471_v6  ;;  %v164_v19 = vadd.s32 %v162_v58, %v156_v59  ;;  %vm165_vm9 = vc.u32 %v163_v53, %v159_v0  ;;  %v261_v25 = vor.u32 %v260_v10, %v259_v5 }
  0x37   :  { %v146_v22 = vadd.s32 %v144_v14, %v142_v12  ;;  %v166_v23 = vsel %vm165_vm9, 1, %v1471_v6  ;;  %v263_v26 = vshrl.u32 %v1470_v60, %v1556_v2  ;;  %v1613_v27 = vadd.s32 %v163_v53, %v159_v0 }
  0x38   :  { %v168_v28 = vadd.s32 %v166_v23, %v164_v19  ;;  %vm265_vm10 = vcmp.lt.s32.totalorder %v1565_v9, 1  ;;  %vm267_vm11 = vcmp.lt.s32.totalorder %v1565_v9, 3  ;;  %vm266_vm12 = vcmp.lt.s32.totalorder %v1565_v9, 2 }
  0x39   :  { %v147_v40 = vadd.s32 %v146_v22, %v136_v56  ;;  %v264_v29 = vor.u32 %v263_v26, %v262_v13  ;;  %vm268_vm13 = vcmp.lt.s32.totalorder %v1565_v9, 4  ;;  %v117_v30 = vsel %vm111_vm5, %v114_v24, %v116_v32 }
  0x3a   :  { %v169_v31 = vadd.s32 %v168_v28, %v158_v63  ;;  %v273_v36 = vsel %vm265_vm10, %v1593_v33, %v1595_v34  ;;  %v274_v37 = vsel %vm268_vm13, %v261_v25, 920167782  ;;  %v277_v44 = vsel %vm265_vm10, %v1595_v34, %v258_v21 }
  0x3b   :  { %v1627_v38 = vadd.s32 %v147_v40, %v138_v61  ;;  %v275_v42 = vsel %vm267_vm11, %v258_v21, %v274_v37  ;;  %v282_v39 = vand.u32 65535, %v1537_v41  ;;  %v278_v46 = vsel %vm268_vm13, %v264_v29, 1326507024 }
  0x3c   :  { %v170_v24 = vadd.s32 %v169_v31, %v160_v4  ;;  %v276_v32 = vsel %vm266_vm12, %v273_v36, %v275_v42  ;;  %v283_v48 = vshrl.u32 %v1537_v41, 16  ;;  %v171_v50 = vmul.u32 %v1531_v35, %v117_v30 }
  0x3d   :  { %vm173_vm14 = vc.u32 %v1627_v38, %v1613_v27  ;;  %v279_v52 = vsel %vm267_vm11, %v261_v25, %v278_v46  ;;  %v306_v55 = vand.u32 65535, %v276_v32  ;;  %v307_v59 = vshrl.u32 %v276_v32, 16 }
  0x3e   :  { %v174_v56 = vadd.s32 1, %v170_v24  ;;  %v280_v57 = vsel %vm266_vm12, %v277_v44, %v279_v52  ;;  %v249_v61 = vshrl.u32 %v1465_v43, %v1556_v2  ;;  %v270_v0 = vsel %vm268_vm13, %v258_v21, 2102212464 }
  0x3f   :  { %v284_v62 = vand.u32 65535, %v280_v57  ;;  %v285_v63 = vshrl.u32 %v280_v57, 16  ;;  %v309_v3 = vmul.u32 %v307_v59, %v282_v39  ;;  %v310_v4 = vmul.u32 %v306_v55, %v283_v48 }
  0x40   :  { %v175_v35 = vsel %vm173_vm14, %v174_v56, %v170_v24  ;;  %v308_v10 = vmul.u32 %v306_v55, %v282_v39  ;;  %v400_v13 = vsel %vm399_vm15, %v1545_v54, 0  ;;  %v269_v2 = vsel %vm265_vm10, %v249_v61, %v1593_v33 }
  0x41   :  { %v176_v5 = vadd.s32 %v175_v35, %v171_v50  ;;  %v286_v7 = vmul.u32 %v284_v62, %v282_v39  ;;  %v287_v53 = vmul.u32 %v285_v63, %v282_v39  ;;  %v288_v12 = vmul.u32 %v284_v62, %v283_v48 }
  0x42   :  { %v312_v58 = vshll.u32 %v309_v3, 16  ;;  %v289_v19 = vmul.u32 %v285_v63, %v283_v48  ;;  %v271_v21 = vsel %vm267_vm11, %v1595_v34, %v270_v0  ;;  %v311_v25 = vmul.u32 %v307_v59, %v283_v48 }
  0x43   :  { %v177_v14 = vadd.s32 536870912, %v176_v5  ;;  %v290_v22 = vshll.u32 %v287_v53, 16  ;;  %v292_v23 = vshll.u32 %v288_v12, 16  ;;  %v314_v26 = vshll.u32 %v310_v4, 16 }
  0x44   :  { %vm316_vm1 = vc.u32 %v308_v10, %v312_v58  ;;  %v291_v54 = vshrl.u32 %v287_v53, 16  ;;  %v318_v33 = vadd.s32 %v312_v58, %v308_v10  ;;  %v313_v37 = vshrl.u32 %v309_v3, 16 }
  0x45   :  { %v1659_v28 = vshrl.u32 %v177_v14, 30  ;;  %vm294_vm0 = vc.u32 %v286_v7, %v290_v22  ;;  %v296_v40 = vadd.s32 %v290_v22, %v286_v7  ;;  %v317_v30 = vsel %vm316_vm1, 1, %v1471_v6 }
  0x46   :  { %v295_v29 = vsel %vm294_vm0, 1, %v1471_v6  ;;  %v293_v34 = vshrl.u32 %v288_v12, 16  ;;  %v319_v44 = vadd.s32 %v317_v30, %v311_v25  ;;  %vm320_vm3 = vc.u32 %v318_v33, %v314_v26 }
  0x47   :  { %v179_v31 = vshll.u32 %v1659_v28, 30  ;;  %v297_v36 = vadd.s32 %v295_v29, %v289_v19  ;;  %vm298_vm2 = vc.u32 %v296_v40, %v292_v23  ;;  %v321_v32 = vsel %vm320_vm3, 1, %v1471_v6 }
  0x48   :  { %v299_v42 = vsel %vm298_vm2, 1, %v1471_v6  ;;  %v402_v46 = vand.u32 31, %v400_v13  ;;  %v315_v48 = vshrl.u32 %v310_v4, 16  ;;  %v323_v50 = vadd.s32 %v321_v32, %v319_v44 }
  0x49   :  { %v1665_v39 = vsub.s32 %v176_v5, %v179_v31  ;;  %v301_v24 = vadd.s32 %v299_v42, %v297_v36  ;;  %v1670_v56 = vadd.s32 %v318_v33, %v314_v26  ;;  %v272_v57 = vsel %vm266_vm12, %v269_v2, %v271_v21 }
  0x4a   :  { %v324_v59 = vadd.s32 %v323_v50, %v313_v37  ;;  %v1677_v63 = vsub.s32 32, %v402_v46  ;;  %v326_v3 = vmul.u32 %v1537_v41, %v272_v57  ;;  %v388_v5 = vand.u32 2147483647, %v1520_v17 }
  0x4b   :  { %vm181_vm4 = vcmp.lt.s32.totalorder %v1665_v39, 0  ;;  %v182_v52 = vsub.s32 0, %v1665_v39  ;;  %v302_v55 = vadd.s32 %v301_v24, %v291_v54  ;;  %v1683_v7 = vshrl.u32 %v400_v13, 5 }
  0x4c   :  { %v325_v0 = vadd.s32 %v324_v59, %v315_v48  ;;  %v408_v9 = vshll.u32 %v1466_v45, %v402_v46  ;;  %v409_v53 = vshrl.u32 %v1467_v47, %v1677_v63  ;;  %v411_v10 = vshll.u32 %v1467_v47, %v402_v46 }
  0x4d   :  { %v183_v61 = vsel %vm181_vm4, %v182_v52, %v1665_v39  ;;  %v1675_v62 = vadd.s32 %v302_v55, %v293_v34  ;;  %v414_v14 = vshll.u32 %v1468_v49, %v402_v46  ;;  %v415_v41 = vshrl.u32 %v1469_v51, %v1677_v63 }
  0x4e   :  { %v184_v35 = vclz %v183_v61  ;;  %v329_v4 = vadd.s32 1, %v325_v0  ;;  %v412_v19 = vshrl.u32 %v1468_v49, %v1677_v63  ;;  %v417_v13 = vshll.u32 %v1469_v51, %v402_v46 }
  0x4f   :  { %vm328_vm5 = vc.u32 %v1675_v62, %v1670_v56  ;;  %v418_v22 = vshrl.u32 %v1470_v60, %v1677_v63  ;;  %v395_v21 = vand.u32 8388607, %v388_v5  ;;  %v405_v23 = vshll.u32 %v1465_v43, %v402_v46 }
  0x50   :  { %v1348_v12 = vadd.s32 4294967294, %v184_v35  ;;  %v330_v58 = vsel %vm328_vm5, %v329_v4, %v325_v0  ;;  %v406_v25 = vshrl.u32 %v1466_v45, %v1677_v63  ;;  %v1702_v40 = vor.u32 %v409_v53, %v408_v9 }
  0x51   :  { %v331_v2 = vadd.s32 %v330_v58, %v326_v3  ;;  %v416_v54 = vor.u32 %v415_v41, %v414_v14  ;;  %v1706_v30 = vor.u32 %v412_v19, %v411_v10  ;;  %v419_v33 = vor.u32 %v418_v22, %v417_v13 }
  0x52   :  { %vm1349_vm6 = vcmp.lt.s32.totalorder %v1348_v12, 0  ;;  %vm423_vm7 = vcmp.lt.s32.totalorder %v1683_v7, 4  ;;  %v396_v31 = vor.u32 8388608, %v395_v21  ;;  %v1709_v36 = vor.u32 %v406_v25, %v405_v23 }
  0x53   :  { %v332_v26 = vadd.s32 536870912, %v331_v2  ;;  %vm420_vm8 = vcmp.lt.s32.totalorder %v1683_v7, 1  ;;  %v187_v37 = vsel %vm1349_vm6, 0, %v1348_v12  ;;  %vm422_vm9 = vcmp.lt.s32.totalorder %v1683_v7, 3 }
  0x54   :  { %v48_v42 = vadd.s32 24, %v1501_v1  ;;  %vm421_vm10 = vcmp.lt.s32.totalorder %v1683_v7, 2  ;;  %v429_v44 = vsel %vm423_vm7, %v416_v54, 920167782  ;;  %v432_v32 = vsel %vm420_vm8, %v1702_v40, %v1706_v30 }
  0x55   :  { %v1704_v29 = vshrl.u32 %v332_v26, 30  ;;  %v433_v46 = vsel %vm423_vm7, %v419_v33, 1326507024  ;;  %v192_v48 = vsub.s32 4294967266, %v187_v37  ;;  %v428_v1 = vsel %vm420_vm8, %v1709_v36, %v1702_v40 }
  0x56   :  { %v434_v50 = vsel %vm422_vm9, %v416_v54, %v433_v46  ;;  %v1732_v52 = vshll.u32 %v396_v31, 8  ;;  %v430_v57 = vsel %vm422_vm9, %v1706_v30, %v429_v44  ;;  %v52_v61 = vmul.u32 4, %v48_v42 }
  0x57   :  { %v334_v34 = vshll.u32 %v1704_v29, 30  ;;  %v435_v59 = vsel %vm421_vm10, %v432_v32, %v434_v50  ;;  %v172_v4 = vadd.s32 %v1613_v27, %v1627_v38  ;;  %v188_v10 = vsub.s32 32, %v187_v37 }
  0x58   :  { %v437_v35 = vand.u32 65535, %v1732_v52  ;;  %v438_v0 = vshrl.u32 %v1732_v52, 16  ;;  %v439_v3 = vand.u32 65535, %v435_v59  ;;  %v440_v53 = vshrl.u32 %v435_v59, 16 }
  0x59   :  { %v1718_v24 = vsub.s32 %v331_v2, %v334_v34  ;;  %v431_v58 = vsel %vm421_vm10, %v428_v1, %v430_v57  ;;  %v193_v41 = vadd.s32 127, %v192_v48  ;;  %v61_v13 = vcvt.s32.f32 %v52_v61 }
  0x5a   :  { %v1748_v14 = vmul.u32 %v439_v3, %v438_v0  ;;  %v441_v2 = vmul.u32 %v439_v3, %v437_v35  ;;  %v442_v19 = vmul.u32 %v440_v53, %v437_v35  ;;  %v189_v21 = vshll.u32 %v1665_v39, %v187_v37 }
  0x5b   :  { %vm336_vm11 = vcmp.lt.s32.totalorder %v1718_v24, 0  ;;  %v337_v55 = vsub.s32 0, %v1718_v24  ;;  %v462_v38 = vshrl.u32 %v431_v58, 16  ;;  %v190_v25 = vshrl.u32 %v172_v4, %v188_v10 }
  0x5c   :  { %v445_v23 = vshll.u32 %v442_v19, 16  ;;  %v447_v27 = vshll.u32 %v1748_v14, 16  ;;  %v444_v26 = vmul.u32 %v440_v53, %v438_v0  ;;  %v461_v54 = vand.u32 65535, %v431_v58 }
  0x5d   :  { %v338_v9 = vsel %vm336_vm11, %v337_v55, %v1718_v24  ;;  %v194_v33 = vshll.u32 %v193_v41, 23  ;;  %v464_v32 = vmul.u32 %v462_v38, %v437_v35  ;;  %v69_v46 = vadd.f32 %v1506_v8, %v61_v13 }
  0x5e   :  { %v339_v12 = vclz %v338_v9  ;;  %vm449_vm13 = vc.u32 %v441_v2, %v445_v23  ;;  %v451_v34 = vadd.s32 %v445_v23, %v441_v2  ;;  %v404_v39 = vshrl.u32 %v1465_v43, %v1677_v63 }
  0x5f   :  { %v450_v44 = vsel %vm449_vm13, 1, %v1471_v6  ;;  %v465_v48 = vmul.u32 %v461_v54, %v438_v0  ;;  %v191_v1 = vor.u32 %v190_v25, %v189_v21  ;;  %v195_v50 = vor.u32 4788187, %v194_v33 }
  0x60   :  { %v1351_v22 = vadd.s32 4294967294, %v339_v12  ;;  %vm453_vm14 = vc.u32 %v451_v34, %v447_v27  ;;  %v452_v37 = vadd.s32 %v450_v44, %v444_v26  ;;  %v327_v55 = vadd.s32 %v1670_v56, %v1675_v62 }
  0x61   :  { %v463_v57 = vmul.u32 %v461_v54, %v437_v35  ;;  %v425_v61 = vsel %vm423_vm7, %v1706_v30, 2102212464  ;;  %v446_v3 = vshrl.u32 %v442_v19, 16  ;;  %v454_v4 = vsel %vm453_vm14, 1, %v1471_v6 }
  0x62   :  { %vm1352_vm12 = vcmp.lt.s32.totalorder %v1351_v22, 0  ;;  %v456_v9 = vadd.s32 %v454_v4, %v452_v37  ;;  %v466_v53 = vmul.u32 %v462_v38, %v438_v0  ;;  %v467_v63 = vshll.u32 %v464_v32, 16 }
  0x63   :  { %v342_v31 = vsel %vm1352_vm12, 0, %v1351_v22  ;;  %v1763_v10 = vmul.f32 %v1508_v11, %v69_v46  ;;  %v424_v56 = vsel %vm420_vm8, %v404_v39, %v1709_v36  ;;  %v469_v62 = vshll.u32 %v465_v48, 16 }
  0x64   :  { %v347_v42 = vsub.s32 4294967266, %v342_v31  ;;  %v343_v59 = vsub.s32 32, %v342_v31  ;;  %v196_v35 = vand.u32 2147483647, %v195_v50  ;;  %v198_v12 = vcvt.s32.f32 %v191_v1 }
  0x65   :  { %v426_v30 = vsel %vm422_vm9, %v1702_v40, %v425_v61  ;;  %vm471_vm15 = vc.u32 %v463_v57, %v467_v63  ;;  %v344_v58 = vshll.u32 %v1718_v24, %v342_v31  ;;  %v473_v2 = vadd.s32 %v467_v63, %v463_v57 }
  0x66   :  { %v348_v8 = vadd.s32 127, %v347_v42  ;;  %v345_v41 = vshrl.u32 %v327_v55, %v343_v59  ;;  %v472_v0 = vsel %vm471_vm15, 1, %v1471_v6  ;;  %v448_v19 = vshrl.u32 %v1748_v14, 16 }
  0x67   :  { %v457_v13 = vadd.s32 %v456_v9, %v446_v3  ;;  %v474_v22 = vadd.s32 %v472_v0, %v466_v53  ;;  %v468_v36 = vshrl.u32 %v464_v32, 16  ;;  %vm475_vm0 = vc.u32 %v473_v2, %v469_v62 }
  0x68   :  { %v349_v11 = vshll.u32 %v348_v8, 23  ;;  %v427_v21 = vsel %vm421_vm10, %v424_v56, %v426_v30  ;;  %v476_v23 = vsel %vm475_vm0, 1, %v1471_v6  ;;  %v546_v40 = vand.u32 2139095040, %v1763_v10 }
  0x69   :  { %v199_v27 = vmul.f32 %v198_v12, %v196_v35  ;;  %v346_v24 = vor.u32 %v345_v41, %v344_v58  ;;  %v470_v38 = vshrl.u32 %v465_v48, 16  ;;  %v478_v25 = vadd.s32 %v476_v23, %v474_v22 }
  0x6a   :  { %v350_v26 = vor.u32 4788187, %v349_v11  ;;  %v1778_v54 = vadd.s32 %v457_v13, %v448_v19  ;;  %v1780_v33 = vadd.s32 %v473_v2, %v469_v62  ;;  %v547_v14 = vshrl.u32 %v546_v40, 23 }
  0x6b   :  { %v479_v31 = vadd.s32 %v478_v25, %v468_v36  ;;  %v200_v42 = vxor.u32 2147483648, %v199_v27  ;;  %v481_v7 = vmul.u32 %v1732_v52, %v427_v21  ;;  %v353_v46 = vcvt.s32.f32 %v346_v24 }
  0x6c   :  { %v1356_v34 = vadd.s32 4294967169, %v547_v14  ;;  %v351_v32 = vand.u32 2147483647, %v350_v26  ;;  %vm483_vm1 = vc.u32 %v1778_v54, %v1780_v33  ;;  %vm80_vm2 = vcmp.lt.s32.totalorder %v1514_v15, 0 }
  0x6d   :  { %v480_v44 = vadd.s32 %v479_v31, %v470_v38  ;;  %vm1788_vm4 = vcmp.le.f32.partialorder %v78_v18, 0.7853982  ;;  %v201_v52 = vsel %vm80_vm2, %v200_v42, %v199_v27  ;;  %v543_v59 = vand.u32 2147483647, %v1763_v10 }
  0x6e   :  { %v553_v39 = vadd.s32 1, %v1356_v34  ;;  %v354_v55 = vmul.f32 %v353_v46, %v351_v32  ;;  %v1798_v4 = vsel %vm1788_vm4, %v1514_v15, %v201_v52  ;;  %vm235_vm5 = vcmp.lt.s32.totalorder %v1517_v16, 0 }
  0x6f   :  { %v484_v37 = vadd.s32 1, %v480_v44  ;;  %v550_v53 = vand.u32 8388607, %v543_v59  ;;  %v1822_v2 = vmul.f32 %v1798_v4, %v1798_v4  ;;  %vm1826_vm6 = vcmp.le.f32.partialorder %v233_v20, 0.7853982 }
  0x70   :  { %vm554_vm3 = vcmp.gt.s32.totalorder %v553_v39, 0  ;;  %v355_v8 = vxor.u32 2147483648, %v354_v55  ;;  %v202_v31 = vsub.s32 4, %v1659_v28  ;;  %vm390_vm13 = vcmp.lt.s32.totalorder %v1520_v17, 0 }
  0x71   :  { %v485_v1 = vsel %vm483_vm1, %v484_v37, %v480_v44  ;;  %v555_v50 = vsel %vm554_vm3, %v553_v39, 0  ;;  %v551_v13 = vor.u32 8388608, %v550_v53  ;;  %v214_v27 = vmul.f32 -0.00019511016, %v1822_v2 }
  0x72   :  { %v486_v57 = vadd.s32 %v485_v1, %v481_v7  ;;  %v557_v61 = vand.u32 31, %v555_v50  ;;  %v1815_v58 = vshrl.u32 %v555_v50, 5  ;;  %v356_v19 = vsel %vm235_vm5, %v355_v8, %v354_v55 }
  0x73   :  { %v1848_v24 = vsel %vm1826_vm6, %v1517_v16, %v356_v19  ;;  %v1850_v25 = vshll.u32 %v551_v13, 8  ;;  %v207_v42 = vmul.f32 -0.001358992, %v1822_v2  ;;  %v215_v44 = vadd.f32 0.008332121, %v214_v27 }
  0x74   :  { %v487_v3 = vadd.s32 536870912, %v486_v57  ;;  %v1801_v18 = vsub.s32 32, %v557_v61  ;;  %v560_v63 = vshll.u32 %v1465_v43, %v557_v61  ;;  %v563_v62 = vshll.u32 %v1466_v45, %v557_v61 }
  0x75   :  { %v569_v12 = vshll.u32 %v1468_v49, %v557_v61  ;;  %v566_v41 = vshll.u32 %v1467_v47, %v557_v61  ;;  %v572_v21 = vshll.u32 %v1469_v51, %v557_v61  ;;  %vm575_vm8 = vcmp.lt.s32.totalorder %v1815_v58, 1 }
  0x76   :  { %v1803_v9 = vshrl.u32 %v487_v3, 30  ;;  %v561_v56 = vshrl.u32 %v1466_v45, %v1801_v18  ;;  %v564_v35 = vshrl.u32 %v1467_v47, %v1801_v18  ;;  %v567_v0 = vshrl.u32 %v1468_v49, %v1801_v18 }
  0x77   :  { %v570_v11 = vshrl.u32 %v1469_v51, %v1801_v18  ;;  %v573_v20 = vshrl.u32 %v1470_v60, %v1801_v18  ;;  %vm577_vm9 = vcmp.lt.s32.totalorder %v1815_v58, 3  ;;  %vm578_vm10 = vcmp.lt.s32.totalorder %v1815_v58, 4 }
  0x78   :  { %v489_v30 = vshll.u32 %v1803_v9, 30  ;;  %v1834_v22 = vor.u32 %v561_v56, %v560_v63  ;;  %v1836_v49 = vor.u32 %v564_v35, %v563_v62  ;;  %v568_v40 = vor.u32 %v567_v0, %v566_v41 }
  0x79   :  { %v571_v36 = vor.u32 %v570_v11, %v569_v12  ;;  %v574_v38 = vor.u32 %v573_v20, %v572_v21  ;;  %vm576_vm11 = vcmp.lt.s32.totalorder %v1815_v58, 2  ;;  %v357_v7 = vsub.s32 4, %v1704_v29 }
  0x7a   :  { %v490_v47 = vsub.s32 %v486_v57, %v489_v30  ;;  %v583_v26 = vsel %vm575_vm8, %v1834_v22, %v1836_v49  ;;  %v1866_v46 = vmul.f32 %v1848_v24, %v1848_v24  ;;  %v482_v39 = vadd.s32 %v1780_v33, %v1778_v54 }
  0x7b   :  { %v584_v14 = vsel %vm578_vm10, %v571_v36, 920167782  ;;  %v587_v1 = vsel %vm575_vm8, %v1836_v49, %v568_v40  ;;  %v588_v50 = vsel %vm578_vm10, %v574_v38, 1326507024  ;;  %v592_v52 = vand.u32 65535, %v1850_v25 }
  0x7c   :  { %vm491_vm7 = vcmp.lt.s32.totalorder %v490_v47, 0  ;;  %v492_v23 = vsub.s32 0, %v490_v47  ;;  %v585_v34 = vsel %vm577_vm9, %v568_v40, %v584_v14  ;;  %v593_v55 = vshrl.u32 %v1850_v25, 16 }
  0x7d   :  { %v586_v37 = vsel %vm576_vm11, %v583_v26, %v585_v34  ;;  %v589_v61 = vsel %vm577_vm9, %v571_v36, %v588_v50  ;;  %v208_v56 = vadd.f32 0.041655596, %v207_v42  ;;  %v1884_v62 = vmul.f32 %v215_v44, %v1822_v2 }
  0x7e   :  { %v493_v51 = vsel %vm491_vm7, %v492_v23, %v490_v47  ;;  %v616_v54 = vand.u32 65535, %v586_v37  ;;  %v617_v33 = vshrl.u32 %v586_v37, 16  ;;  %v590_v63 = vsel %vm576_vm11, %v587_v1, %v589_v61 }
  0x7f   :  { %v494_v60 = vclz %v493_v51  ;;  %v362_v35 = vmul.f32 -0.001358992, %v1866_v46  ;;  %v594_v12 = vand.u32 65535, %v590_v63  ;;  %v369_v30 = vmul.f32 -0.00019511016, %v1866_v46 }
  0x80   :  { %v595_v11 = vshrl.u32 %v590_v63, 16  ;;  %v619_v13 = vmul.u32 %v617_v33, %v592_v52  ;;  %v620_v36 = vmul.u32 %v616_v54, %v593_v55  ;;  %vm1891_vm14 = vcmp.le.f32.partialorder %v388_v5, 0.7853982 }
  0x81   :  { %v1354_v32 = vadd.s32 4294967294, %v494_v60  ;;  %v598_v19 = vmul.u32 %v594_v12, %v593_v55  ;;  %v596_v27 = vmul.u32 %v594_v12, %v592_v52  ;;  %v559_v38 = vshrl.u32 %v1465_v43, %v1801_v18 }
  0x82   :  { %v597_v51 = vmul.u32 %v595_v11, %v592_v52  ;;  %v599_v60 = vmul.u32 %v595_v11, %v593_v55  ;;  %v621_v26 = vmul.u32 %v617_v33, %v593_v55  ;;  %v622_v14 = vshll.u32 %v619_v13, 16 }
  0x83   :  { %vm1355_vm12 = vcmp.lt.s32.totalorder %v1354_v32, 0  ;;  %v580_v5 = vsel %vm578_vm10, %v568_v40, 2102212464  ;;  %v624_v37 = vshll.u32 %v620_v36, 16  ;;  %v579_v43 = vsel %vm575_vm8, %v559_v38, %v1834_v22 }
  0x84   :  { %v497_v57 = vsel %vm1355_vm12, 0, %v1354_v32  ;;  %v600_v44 = vshll.u32 %v597_v51, 16  ;;  %v602_v32 = vshll.u32 %v598_v19, 16  ;;  %v581_v40 = vsel %vm577_vm9, %v1836_v49, %v580_v5 }
  0x85   :  { %v498_v3 = vsub.s32 32, %v497_v57  ;;  %v499_v8 = vshll.u32 %v490_v47, %v497_v57  ;;  %v502_v53 = vsub.s32 4294967266, %v497_v57  ;;  %v618_v47 = vmul.u32 %v616_v54, %v592_v52 }
  0x86   :  { %vm604_vm0 = vc.u32 %v596_v27, %v600_v44  ;;  %v606_v50 = vadd.s32 %v600_v44, %v596_v27  ;;  %v601_v54 = vshrl.u32 %v597_v51, 16  ;;  %v603_v63 = vshrl.u32 %v598_v19, 16 }
  0x87   :  { %v500_v41 = vshrl.u32 %v482_v39, %v498_v3  ;;  %v503_v0 = vadd.s32 127, %v502_v53  ;;  %v370_v39 = vadd.f32 0.008332121, %v369_v30  ;;  %vm626_vm15 = vc.u32 %v618_v47, %v622_v14 }
  0x88   :  { %v627_v52 = vsel %vm626_vm15, 1, %v1471_v6  ;;  %v605_v18 = vsel %vm604_vm0, 1, %v1471_v6  ;;  %v628_v55 = vadd.s32 %v622_v14, %v618_v47  ;;  %vm608_vm1 = vc.u32 %v606_v50, %v602_v32 }
  0x89   :  { %v501_v20 = vor.u32 %v500_v41, %v499_v8  ;;  %v504_v23 = vshll.u32 %v503_v0, 23  ;;  %v629_v57 = vadd.s32 %v627_v52, %v621_v26  ;;  %v607_v33 = vadd.s32 %v605_v18, %v599_v60 }
  0x8a   :  { %v609_v3 = vsel %vm608_vm1, 1, %v1471_v6  ;;  %v623_v8 = vshrl.u32 %v619_v13, 16  ;;  %vm630_vm3 = vc.u32 %v628_v55, %v624_v37  ;;  %v363_v30 = vadd.f32 0.041655596, %v362_v35 }
  0x8b   :  { %v505_v34 = vor.u32 4788187, %v504_v23  ;;  %v508_v42 = vcvt.s32.f32 %v501_v20  ;;  %v611_v12 = vadd.s32 %v609_v3, %v607_v33  ;;  %v631_v22 = vsel %vm630_vm3, 1, %v1471_v6 }
  0x8c   :  { %v371_v41 = vmul.f32 %v370_v39, %v1866_v46  ;;  %v625_v0 = vshrl.u32 %v620_v36, 16  ;;  %v633_v11 = vadd.s32 %v631_v22, %v629_v57  ;;  %v1912_v23 = vadd.s32 %v628_v55, %v624_v37 }
  0x8d   :  { %v506_v1 = vand.u32 2147483647, %v505_v34  ;;  %v612_v20 = vadd.s32 %v611_v12, %v601_v54  ;;  %v203_v49 = vsel %vm80_vm2, %v202_v31, %v1659_v28  ;;  %v582_v19 = vsel %vm576_vm11, %v579_v43, %v581_v40 }
  0x8e   :  { %v634_v13 = vadd.s32 %v633_v11, %v623_v8  ;;  %v209_v36 = vmul.f32 %v208_v56, %v1822_v2  ;;  %v358_v27 = vsel %vm235_vm5, %v357_v7, %v1704_v29  ;;  %v217_v51 = vadd.f32 -0.16666654, %v1884_v62 }
  0x8f   :  { %v509_v61 = vmul.f32 %v508_v42, %v506_v1  ;;  %v1934_v31 = vadd.s32 %v612_v20, %v603_v63  ;;  %v364_v38 = vmul.f32 %v363_v30, %v1866_v46  ;;  %v372_v58 = vadd.f32 -0.16666654, %v371_v41 }
  0x90   :  { %v635_v60 = vadd.s32 %v634_v13, %v625_v0  ;;  %v636_v56 = vmul.u32 %v1850_v25, %v582_v19  ;;  %v1943_v29 = vsel %vm1788_vm4, 0, %v203_v49  ;;  %v512_v7 = vsub.s32 4, %v1803_v9 }
  0x91   :  { %v510_v53 = vxor.u32 2147483648, %v509_v61  ;;  %vm638_vm2 = vc.u32 %v1934_v31, %v1912_v23  ;;  %v210_v44 = vadd.f32 -0.4999988, %v209_v36  ;;  %v218_v32 = vmul.f32 %v217_v51, %v1822_v2 }
  0x92   :  { %v639_v34 = vadd.s32 1, %v635_v60  ;;  %v360_v39 = vsel %vm1826_vm6, 0, %v358_v27  ;;  %v365_v25 = vadd.f32 -0.4999988, %v364_v38  ;;  %v373_v37 = vmul.f32 %v372_v58, %v1866_v46 }
  0x93   :  { %v511_v47 = vsel %vm390_vm13, %v510_v53, %v509_v61  ;;  %v222_v48 = vadd.s32 3, %v1943_v29  ;;  %v513_v43 = vsel %vm390_vm13, %v512_v7, %v1803_v9  ;;  %v211_v57 = vmul.f32 %v210_v44, %v1822_v2 }
  0x94   :  { %v1922_v35 = vsel %vm1891_vm14, %v1520_v17, %v511_v47  ;;  %v640_v5 = vsel %vm638_vm2, %v639_v34, %v635_v60  ;;  %v219_v61 = vadd.f32 1.0, %v218_v32  ;;  %v377_v45 = vadd.s32 3, %v360_v39 }
  0x95   :  { %v516_v28 = vmul.f32 %v1922_v35, %v1922_v35  ;;  %v641_v50 = vadd.s32 %v640_v5, %v636_v56  ;;  %v366_v54 = vmul.f32 %v365_v25, %v1866_v46  ;;  %v374_v33 = vadd.f32 1.0, %v373_v37 }
  0x96   :  { %v515_v3 = vsel %vm1891_vm14, 0, %v513_v43  ;;  %v223_v63 = vand.u32 3, %v222_v48  ;;  %v1961_v9 = vadd.f32 1.0, %v211_v57  ;;  %v220_v22 = vmul.f32 %v219_v61, %v1798_v4 }
  0x97   :  { %v517_v26 = vmul.f32 -0.001358992, %v516_v28  ;;  %v524_v14 = vmul.f32 -0.00019511016, %v516_v28  ;;  %v642_v55 = vadd.s32 536870912, %v641_v50  ;;  %v378_v2 = vand.u32 3, %v377_v45 }
  0x98   :  { %v1964_v30 = vadd.f32 1.0, %v366_v54  ;;  %v375_v46 = vmul.f32 %v374_v33, %v1848_v24  ;;  %v532_v41 = vadd.s32 3, %v515_v3  ;;  %vm225_vm4 = vcmp.eq.s32.totalorder %v223_v63, 0 }
  0x99   :  { %v518_v42 = vadd.f32 0.041655596, %v517_v26  ;;  %v525_v62 = vadd.f32 0.008332121, %v524_v14  ;;  %v1956_v40 = vshrl.u32 %v642_v55, 30  ;;  %v226_v20 = vxor.u32 2147483648, %v220_v22 }
  0x9a   :  { %vm228_vm6 = vcmp.eq.s32.totalorder %v223_v63, 2  ;;  %v229_v49 = vxor.u32 2147483648, %v1961_v9  ;;  %vm380_vm7 = vcmp.eq.s32.totalorder %v378_v2, 0  ;;  %v381_v19 = vxor.u32 2147483648, %v375_v46  ;;  %v1314_v55 = vld [vmem:[%s2030_s2] sm:$0x1] }
  0x9b   :  { %v526_v1 = vmul.f32 %v525_v62, %v516_v28  ;;  %v519_v52 = vmul.f32 %v518_v42, %v516_v28  ;;  %v644_v12 = vshll.u32 %v1956_v40, 30  ;;  %v384_v4 = vxor.u32 2147483648, %v1964_v30  ;;  %s1472_s2 = smov [#allocation7]  }
  0x9c   :  { %v533_v13 = vand.u32 3, %v532_v41  ;;  %vm383_vm8 = vcmp.eq.s32.totalorder %v378_v2, 2  ;;  %vm224_vm9 = vcmp.lt.s32.totalorder %v223_v63, 2  ;;  %vm379_vm10 = vcmp.lt.s32.totalorder %v378_v2, 2  ;;  %s1331_s22 = sshll.u32 %s1472_s2, 4  ;;  %s1332_s22 = int_to_ptr.vmem [resolvable:$true] %s1331_s22 }
  0x9d   :  { %v527_v18 = vadd.f32 -0.16666654, %v526_v1  ;;  %v520_v8 = vadd.f32 -0.4999988, %v519_v52  ;;  %v645_v0 = vsub.s32 %v641_v50, %v644_v12  ;;  %v227_v58 = vsel %vm225_vm4, %v1961_v9, %v226_v20 }
  0x9e   :  { %v382_v60 = vsel %vm380_vm7, %v1964_v30, %v381_v19  ;;  %v385_v26 = vsel %vm383_vm8, %v384_v4, %v375_v46  ;;  %vm535_vm11 = vcmp.eq.s32.totalorder %v533_v13, 0  ;;  %vm221_vm12 = vweird.f32 %v1514_v15 }
  0x9f   :  { %v528_v53 = vmul.f32 %v527_v18, %v516_v28  ;;  %v521_v11 = vmul.f32 %v520_v8, %v516_v28  ;;  %vm646_vm5 = vcmp.lt.s32.totalorder %v645_v0, 0  ;;  %v647_v21 = vsub.s32 0, %v645_v0 }
  0xa0   :  { %v230_v28 = vsel %vm228_vm6, %v229_v49, %v220_v22  ;;  %vm376_vm13 = vweird.f32 %v1517_v16  ;;  %vm538_vm15 = vcmp.eq.s32.totalorder %v533_v13, 2  ;;  %v842_v7 = vand.u32 3, %v1943_v29 }
  0xa1   :  { %v529_v47 = vadd.f32 1.0, %v528_v53  ;;  %v648_v36 = vsel %vm646_vm5, %v647_v21, %v645_v0  ;;  %v522_v27 = vadd.f32 1.0, %v521_v11  ;;  %v996_v42 = vand.u32 3, %v360_v39 }
  0xa2   :  { %v649_v51 = vclz %v648_v36  ;;  %v231_v62 = vsel %vm224_vm9, %v227_v58, %v230_v28  ;;  %v386_v25 = vsel %vm379_vm10, %v382_v60, %v385_v26  ;;  %vm534_vm0 = vcmp.lt.s32.totalorder %v533_v13, 2 }
  0xa3   :  { %v530_v24 = vmul.f32 %v529_v47, %v1922_v35  ;;  %v539_v56 = vxor.u32 2147483648, %v522_v27  ;;  %v637_v35 = vadd.s32 %v1912_v23, %v1934_v31  ;;  %vm844_vm1 = vcmp.eq.s32.totalorder %v842_v7, 0 }
  0xa4   :  { %v1357_v38 = vadd.s32 4294967294, %v649_v51  ;;  %v1150_v37 = vand.u32 3, %v515_v3  ;;  %vm843_vm3 = vcmp.lt.s32.totalorder %v842_v7, 2  ;;  %vm847_vm2 = vcmp.eq.s32.totalorder %v842_v7, 2 }
  0xa5   :  { %v536_v14 = vxor.u32 2147483648, %v530_v24  ;;  %v540_v50 = vsel %vm538_vm15, %v539_v56, %v530_v24  ;;  %vm998_vm4 = vcmp.eq.s32.totalorder %v996_v42, 0  ;;  %vm1001_vm5 = vcmp.eq.s32.totalorder %v996_v42, 2 }
  0xa6   :  { %vm1358_vm14 = vcmp.lt.s32.totalorder %v1357_v38, 0  ;;  %v846_v52 = vsel %vm844_vm1, %v1961_v9, %v226_v20  ;;  %v849_v48 = vsel %vm847_vm2, %v229_v49, %v220_v22  ;;  %vm997_vm6 = vcmp.lt.s32.totalorder %v996_v42, 2 }
  0xa7   :  { %v652_v34 = vsel %vm1358_vm14, 0, %v1357_v38  ;;  %v537_v1 = vsel %vm535_vm11, %v522_v27, %v536_v14  ;;  %v1000_v43 = vsel %vm998_vm4, %v1964_v30, %v381_v19  ;;  %v1003_v18 = vsel %vm1001_vm5, %v384_v4, %v375_v46 }
  0xa8   :  { %v653_v44 = vsub.s32 32, %v652_v34  ;;  %v654_v32 = vshll.u32 %v645_v0, %v652_v34  ;;  %v657_v5 = vsub.s32 4294967266, %v652_v34  ;;  %vm1152_vm7 = vcmp.eq.s32.totalorder %v1150_v37, 0 }
  0xa9   :  { %vm531_vm8 = vweird.f32 %v1520_v17  ;;  %vm1151_vm9 = vcmp.lt.s32.totalorder %v1150_v37, 2  ;;  %v541_v45 = vsel %vm534_vm0, %v537_v1, %v540_v50  ;;  %v850_v54 = vsel %vm843_vm3, %v846_v52, %v849_v48 }
  0xaa   :  { %v655_v23 = vshrl.u32 %v637_v35, %v653_v44  ;;  %v658_v31 = vadd.s32 127, %v657_v5  ;;  %v1154_v33 = vsel %vm1152_vm7, %v522_v27, %v536_v14  ;;  %vm1155_vm10 = vcmp.eq.s32.totalorder %v1150_v37, 2 }
  0xab   :  { %v1004_v8 = vsel %vm997_vm6, %v1000_v43, %v1003_v18  ;;  %v1157_v53 = vsel %vm1155_vm10, %v539_v56, %v530_v24  ;;  %vm1315_vm11 = vcmp.gt.f32.partialorder %v1314_v55, 0.5  ;;  %v232_v63 = vsel %vm221_vm12, nan, %v231_v62 }
  0xac   :  { %v656_v29 = vor.u32 %v655_v23, %v654_v32  ;;  %v659_v39 = vshll.u32 %v658_v31, 23  ;;  %v387_v12 = vsel %vm376_vm13, nan, %v386_v25  ;;  %vm545_vm14 = vcmp.lt.s32.totalorder %v1763_v10, 0 }
  0xad   :  { %v1158_v9 = vsel %vm1151_vm9, %v1154_v33, %v1157_v53  ;;  %v542_v22 = vsel %vm531_vm8, nan, %v541_v45  ;;  %v667_v30 = vsub.s32 4, %v1956_v40  ;;  %v1316_v46 = vsel %vm1315_vm11, 1, %v1471_v6 }
  0xae   :  { %v660_v57 = vor.u32 4788187, %v659_v39  ;;  %v663_v61 = vcvt.s32.f32 %v656_v29  ;;  %v851_v41 = vsel %vm221_vm12, nan, %v850_v54  ;;  %v1005_v0 = vsel %vm376_vm13, nan, %v1004_v8 }
  0xaf   :  { %v1159_v11 = vsel %vm531_vm8, nan, %v1158_v9  ;;  %v1317_v47 = vperm.slane %v1316_v46, 0  ;;  %vm544_vm15 = vcmp.le.f32.partialorder %v543_v59, 0.7853982  ;;  %v668_v59 = vsel %vm545_vm14, %v667_v30, %v1956_v40 }
  0xb0   :  { %v661_v3 = vand.u32 2147483647, %v660_v57  ;;  %v670_v4 = vsel %vm544_vm15, 0, %v668_v59  ;;  %vm686_vm5 = vweird.f32 %v1763_v10 }
  0xb1   :  { %vm2006_vm0 = vcmp.eq.s32.totalorder %v1317_v47, 1  ;;  %v687_v51 = vadd.s32 3, %v670_v4  ;;  %v1304_v14 = vand.u32 3, %v670_v4 }
  0xb2   :  { %v664_v2 = vmul.f32 %v663_v61, %v661_v3  ;;  %v1319_v15 = vsel %vm2006_vm0, %v851_v41, %v232_v63  ;;  %v1320_v16 = vsel %vm2006_vm0, %v1005_v0, %v387_v12  ;;  %v1321_v17 = vsel %vm2006_vm0, %v1159_v11, %v542_v22 }
  0xb3   :  { %1323 = vst [vmem:[#allocation7] sm:$0xff] %v1319_v15  ;;  %v688_v26 = vand.u32 3, %v687_v51  ;;  %vm1309_vm13 = vcmp.eq.s32.totalorder %v1304_v14, 2  ;;  %vm1306_vm2 = vcmp.eq.s32.totalorder %v1304_v14, 0  ;;  %vm1305_vm4 = vcmp.lt.s32.totalorder %v1304_v14, 2 }
  0xb4   :  { %v665_v21 = vxor.u32 2147483648, %v664_v2  ;;  %1324 = vst [vmem:[#allocation7 + $0x8] sm:$0xff] %v1320_v16 }
  0xb5   :  { %1325 = vst [vmem:[#allocation7 + $0x10] sm:$0xff] %v1321_v17  ;;  %vm693_vm12 = vcmp.eq.s32.totalorder %v688_v26, 2  ;;  %vm689_vm1 = vcmp.lt.s32.totalorder %v688_v26, 2  ;;  %vm690_vm3 = vcmp.eq.s32.totalorder %v688_v26, 0 }
  0xb6   :  { %v666_v6 = vsel %vm545_vm14, %v665_v21, %v664_v2 }
  0xb7   :  { %v669_v49 = vsel %vm544_vm15, %v1763_v10, %v666_v6 }
  0xb8   :  { %v671_v19 = vmul.f32 %v669_v49, %v669_v49 }
  0xba   :  { %v672_v13 = vmul.f32 -0.001358992, %v671_v19  ;;  %v679_v36 = vmul.f32 -0.00019511016, %v671_v19 }
  0xbc   :  { %v673_v27 = vadd.f32 0.041655596, %v672_v13  ;;  %v680_v24 = vadd.f32 0.008332121, %v679_v36 }
  0xbe   :  { %v674_v28 = vmul.f32 %v673_v27, %v671_v19  ;;  %v681_v38 = vmul.f32 %v680_v24, %v671_v19 }
  0xc0   :  { %v675_v58 = vadd.f32 -0.4999988, %v674_v28  ;;  %v682_v60 = vadd.f32 -0.16666654, %v681_v38 }
  0xc2   :  { %v676_v56 = vmul.f32 %v675_v58, %v671_v19  ;;  %v683_v40 = vmul.f32 %v682_v60, %v671_v19 }
  0xc4   :  { %v677_v35 = vadd.f32 1.0, %v676_v56  ;;  %v684_v34 = vadd.f32 1.0, %v683_v40 }
  0xc6   :  { %v685_v7 = vmul.f32 %v684_v34, %v669_v49  ;;  %v694_v42 = vxor.u32 2147483648, %v677_v35 }
  0xc8   :  { %v691_v62 = vxor.u32 2147483648, %v685_v7  ;;  %v695_v44 = vsel %vm693_vm12, %v694_v42, %v685_v7  ;;  %v1311_v32 = vsel %vm1309_vm13, %v694_v42, %v685_v7 }
  0xca   :  { %v692_v5 = vsel %vm690_vm3, %v677_v35, %v691_v62  ;;  %v1308_v25 = vsel %vm1306_vm2, %v677_v35, %v691_v62 }
  0xcb   :  { %v696_v37 = vsel %vm689_vm1, %v692_v5, %v695_v44  ;;  %v1312_v1 = vsel %vm1305_vm4, %v1308_v25, %v1311_v32 }
  0xcc   :  { %v697_v50 = vsel %vm686_vm5, nan, %v696_v37  ;;  %v1313_v23 = vsel %vm686_vm5, nan, %v1312_v1 }
  0xcd   :  { %v1322_v31 = vsel %vm2006_vm0, %v1313_v23, %v697_v50 }
  0xce   :  { %1326 = vst [vmem:[#allocation7 + $0x18] sm:$0xff] %v1322_v31 }
  0xcf   :  { %1339 = dma.vmem_to_hbm [thread:$0]  %s1332_s22, 512, %s1334_s25, [#allocation4], %s1473_s26, %s1473_s26, %s1474_s27  }
  0xd0   :  { %1461 = dma.done.wait [#allocation4], 512  }
  0xd1   :  { %1462 = vsyncadd [#allocation4], 4294966784 }
  0xd2   :  { %1344 = vsyncpa [#allocation3], 1 }
  0xd3   :  { %1345 = vsyncpa [#allocation6], 1 }
  0xd4   :  { %1346 = vsyncpa [#allocation4], 1 }

</bundles_post_ra>
